<compile_context>
chip_gen: v5e
topology: v5e:2x2
jax: 0.10.0
libtpu: 0.0.40
codegen_flags: <defaults>
</compile_context>

<pallas_src>
import math

import jax
import jax.numpy as jnp
from jax.experimental import pallas as pl
from jax.experimental.pallas import tpu as pltpu


def _make_kernel(compute_dtype):
    def attention_kernel(gp_ref, lpT_ref, ws_ref, bs_ref, out_ref):
        # gp_ref:  (tb, H)  f32  -- goal @ W_g^T rows
        # lpT_ref: (H, tl)  f32  -- (logic @ W_l^T + b_attn)^T, lane-dense in tl
        # ws_ref:  (H, 1)   f32  -- score weight column
        # bs_ref:  (1,)     f32  -- score bias scalar (SMEM)
        # out_ref: (tb, tl) f32  -- lane-dense score tile
        gp = gp_ref[...].astype(compute_dtype)       # (tb, H)
        lpT = lpT_ref[...].astype(compute_dtype)     # (H, tl)
        ws = ws_ref[...].astype(compute_dtype)       # (H, 1)

        # (tb, H, tl): H in sublanes, tl (multiple of 128) in lanes -> dense vregs
        # for the EUP tanh (the binding unit) and the VPU mul.
        feat = jnp.tanh(gp[:, :, None] + lpT[None, :, :])        # (tb, H, tl)
        prod = feat * ws                                         # broadcast (H,1)
        # Accumulate the H reduction in f32 (cheap sublane/VALU adds).
        score = jnp.sum(prod.astype(jnp.float32), axis=1)        # (tb, tl)
        out_ref[...] = (score + bs_ref[0]).astype(out_ref.dtype)

    return attention_kernel


def _ceil_to(x, m):
    return ((x + m - 1) // m) * m


def _chip_flags():
    try:
        kind = jax.devices()[0].device_kind.lower()
    except Exception:
        kind = ""
    is_v7x = ("v7" in kind) or ("7x" in kind)
    use_bf16 = is_v7x or ("v6" in kind)   # bf16 VPU/EUP only on v6e / v7x
    return is_v7x, use_bf16


def _pick_tiles(B, L, H, elem_bytes, feat_budget, prefer_split):
    # Lane tile over logic_len: multiple of 128 for dense vregs / unmasked stores.
    tl = min(_ceil_to(max(L, 1), 128), 512)
    # Sublane tile over batch: keep the (tb, H, tl) intermediate <= feat_budget.
    tb = feat_budget // (elem_bytes * tl * max(H, 1))
    tb = max(8, min(512, (tb // 8) * 8))
    tb = min(tb, _ceil_to(B, 8))
    # v7x megacore: if the grid would be 1x1, split the logic axis so both
    # TensorCores get a tile (no-op when tl is already the minimum 128).
    if prefer_split and _ceil_to(B, tb) // tb == 1 and _ceil_to(L, tl) // tl == 1 and tl > 128:
        tl = _ceil_to(tl // 2, 128)
    return tb, tl


def attention_forward(goal, logic, w_attn, b_attn, w_score, b_score):
    """Pallas implementation of Attention.forward.

    goal:  (B, 1, input_size)
    logic: (logic_len, hidden_size)
    returns: (B, logic_len) attention energies (float32)
    """
    B = goal.shape[0]
    I = goal.shape[-1]
    L, H = logic.shape

    is_v7x, use_bf16 = _chip_flags()
    compute_dtype = jnp.bfloat16 if use_bf16 else jnp.float32

    goal2d = goal.reshape(B, I).astype(jnp.float32)
    logic2d = logic.astype(jnp.float32)
    w_attn32 = w_attn.astype(jnp.float32)

    # Hoisted tiny GEMMs (plain XLA):  attn([g;l]) = g @ Wg^T + l @ Wl^T + b_attn
    gp = goal2d @ w_attn32[:, :I].T                                    # (B, H)
    lpT = (logic2d @ w_attn32[:, I:].T + b_attn.astype(jnp.float32)).T  # (H, L)
    ws_col = w_score.reshape(H, 1).astype(jnp.float32)                 # (H, 1)
    bs = b_score.reshape(1).astype(jnp.float32)                        # SMEM scalar

    elem_bytes = 2 if use_bf16 else 4
    feat_budget = (6 << 20) if is_v7x else (8 << 20)   # v7x: 64 MiB physical VMEM
    tb, tl = _pick_tiles(B, L, H, elem_bytes, feat_budget, prefer_split=is_v7x)
    B_pad = _ceil_to(B, tb)
    L_pad = _ceil_to(L, tl)

    gp_p = jnp.pad(gp, ((0, B_pad - B), (0, 0)))
    lpT_p = jnp.pad(lpT, ((0, 0), (0, L_pad - L)))

    grid = (B_pad // tb, L_pad // tl)
    vmem_limit = (40 << 20) if is_v7x else (64 << 20)

    cost = pl.CostEstimate(
        flops=int(3 * B_pad * L_pad * H),
        transcendentals=int(B_pad * L_pad * H),
        bytes_accessed=int(4 * (B_pad * L_pad + B_pad * H + H * L_pad)),
    )

    out = pl.pallas_call(
        _make_kernel(compute_dtype),
        out_shape=jax.ShapeDtypeStruct((B_pad, L_pad), jnp.float32),
        grid_spec=pltpu.PrefetchScalarGridSpec(
            num_scalar_prefetch=0,
            grid=grid,
            in_specs=[
                pl.BlockSpec((tb, H), lambda i, j: (i, 0)),          # gp rows
                pl.BlockSpec((H, tl), lambda i, j: (0, j)),          # lpT columns
                pl.BlockSpec((H, 1), lambda i, j: (0, 0)),           # w_score column
                pl.BlockSpec(memory_space=pltpu.MemorySpace.SMEM),   # b_score
            ],
            out_specs=pl.BlockSpec((tb, tl), lambda i, j: (i, j)),
        ),
        compiler_params=pltpu.CompilerParams(
            # Both grid axes are independent -> megacore sharding on v7x.
            dimension_semantics=("parallel", "parallel"),
            vmem_limit_bytes=vmem_limit,
        ),
        cost_estimate=cost,
    )(gp_p, lpT_p, ws_col, bs)

    # Slice off batch / logic_len padding.
    return out[:B, :L]


if __name__ == "__main__":
    input_size = 16
    hidden_size = 32
    B = 2
    L = 8

    key = jax.random.PRNGKey(0)
    k1, k2, k3, k4, k5, k6 = jax.random.split(key, 6)

    # Deterministic synthetic parameters, shaped like nn.Linear (out, in) + (out,)
    in_attn = hidden_size + input_size
    ka = 1.0 / math.sqrt(in_attn)
    w_attn = jax.random.uniform(k1, (hidden_size, in_attn), jnp.float32, -ka, ka)
    b_attn = jax.random.uniform(k2, (hidden_size,), jnp.float32, -ka, ka)
    ks = 1.0 / math.sqrt(hidden_size)
    w_score = jax.random.uniform(k3, (1, hidden_size), jnp.float32, -ks, ks)
    b_score = jax.random.uniform(k4, (1,), jnp.float32, -ks, ks)

    goal = jax.random.normal(k5, (B, 1, input_size), jnp.float32)
    logic = jax.random.normal(k6, (L, hidden_size), jnp.float32)

    out = attention_forward(goal, logic, w_attn, b_attn, w_score, b_score)
    out = jax.block_until_ready(out)

    # Pure-JAX reference that mirrors the PyTorch module exactly (concat + GEMM).
    goal_rep = jnp.broadcast_to(goal, (B, L, input_size))
    logic_rep = jnp.broadcast_to(logic[None, :, :], (B, L, hidden_size))
    e_in = jnp.concatenate([goal_rep, logic_rep], axis=2).reshape(-1, in_attn)
    ref = (jnp.tanh(e_in @ w_attn.T + b_attn) @ w_score.T + b_score).reshape(B, L)

    _, _use_bf16 = _chip_flags()
    atol = 5e-2 if _use_bf16 else 1e-5
    rtol = 5e-2 if _use_bf16 else 1e-5

    assert out.shape == (B, L), out.shape
    assert jnp.allclose(out, ref, atol=atol, rtol=rtol), "mismatch vs reference"
    print("KERNEL_OK")
</pallas_src>

<mosaic_0001>
module attributes {stable_mosaic.version = 11 : i64} {
  func.func @attention_kernel(%arg0: i32, %arg1: i32, %arg2: memref<8x32xf32, #tpu.memory_space<vmem>>, %arg3: memref<32x128xf32, #tpu.memory_space<vmem>>, %arg4: memref<32x1xf32, #tpu.memory_space<vmem>>, %arg5: memref<1xf32, #tpu.memory_space<smem>>, %arg6: memref<8x128xf32, #tpu.memory_space<vmem>>) attributes {dimension_semantics = [#tpu.dimension_semantics<parallel>, #tpu.dimension_semantics<parallel>], iteration_bounds = array<i64: 1, 1>, scalar_prefetch = 0 : i64, scratch_operands = 0 : i64, tpu.core_type = #tpu.core_type<tc>, window_params = [{transform_indices = @transform_0, window_bounds = array<i64: 8, 32>}, {transform_indices = @transform_1, window_bounds = array<i64: 32, 128>}, {pipeline_mode = #tpu.pipeline_mode<synchronous>, transform_indices = @transform_2, window_bounds = array<i64: 32, 1>}, {transform_indices = @transform_3, window_bounds = array<i64: 1>}, {transform_indices = @transform_4, window_bounds = array<i64: 8, 128>}]} {
    %c0 = arith.constant 0 : index
    %c0_0 = arith.constant 0 : index
    %0 = vector.load %arg2[%c0, %c0_0] : memref<8x32xf32, #tpu.memory_space<vmem>>, vector<8x32xf32>
    %c0_1 = arith.constant 0 : index
    %c0_2 = arith.constant 0 : index
    %1 = vector.load %arg3[%c0_1, %c0_2] : memref<32x128xf32, #tpu.memory_space<vmem>>, vector<32x128xf32>
    %c0_3 = arith.constant 0 : index
    %c0_4 = arith.constant 0 : index
    %2 = vector.load %arg4[%c0_3, %c0_4] : memref<32x1xf32, #tpu.memory_space<vmem>>, vector<32x1xf32>
    %3 = vector.shape_cast %0 : vector<8x32xf32> to vector<8x32x1xf32>
    %4 = vector.shape_cast %1 : vector<32x128xf32> to vector<1x32x128xf32>
    %5 = vector.broadcast %3 : vector<8x32x1xf32> to vector<8x32x128xf32>
    %6 = vector.broadcast %4 : vector<1x32x128xf32> to vector<8x32x128xf32>
    %7 = arith.addf %5, %6 : vector<8x32x128xf32>
    %8 = math.tanh %7 : vector<8x32x128xf32>
    %9 = vector.shape_cast %2 : vector<32x1xf32> to vector<1x32x1xf32>
    %10 = vector.broadcast %9 : vector<1x32x1xf32> to vector<8x32x128xf32>
    %11 = arith.mulf %8, %10 : vector<8x32x128xf32>
    %cst = arith.constant dense<0.000000e+00> : vector<8x128xf32>
    %12 = vector.multi_reduction <add>, %11, %cst [1] : vector<8x32x128xf32> to vector<8x128xf32>
    %c0_5 = arith.constant 0 : index
    %13 = memref.load %arg5[%c0_5] : memref<1xf32, #tpu.memory_space<smem>>
    %14 = vector.broadcast %13 : f32 to vector<8x128xf32>
    %15 = arith.addf %12, %14 : vector<8x128xf32>
    %c0_6 = arith.constant 0 : index
    %c0_7 = arith.constant 0 : index
    %16 = vector.load %arg6[%c0_6, %c0_7] : memref<8x128xf32, #tpu.memory_space<vmem>>, vector<8x128xf32>
    tpu.vector_store %arg6[%c0_6, %c0_7], %15 {strides = array<i32>} : memref<8x128xf32, #tpu.memory_space<vmem>>, vector<8x128xf32>,
    return
  }
  func.func @transform_0(%arg0: i32, %arg1: i32) -> (i32, i32) {
    %c0_i32 = arith.constant 0 : i32
    %c0_i32_0 = arith.constant 0 : i32
    return %arg0, %c0_i32 : i32, i32
  }
  func.func @transform_1(%arg0: i32, %arg1: i32) -> (i32, i32) {
    %c0_i32 = arith.constant 0 : i32
    %c0_i32_0 = arith.constant 0 : i32
    return %c0_i32, %arg1 : i32, i32
  }
  func.func @transform_2(%arg0: i32, %arg1: i32) -> (i32, i32) {
    %c0_i32 = arith.constant 0 : i32
    %c0_i32_0 = arith.constant 0 : i32
    %c0_i32_1 = arith.constant 0 : i32
    return %c0_i32, %c0_i32_0 : i32, i32
  }
  func.func @transform_3(%arg0: i32, %arg1: i32) -> i32 {
    %c0_i32 = arith.constant 0 : i32
    %c0_i32_0 = arith.constant 0 : i32
    return %c0_i32 : i32
  }
  func.func @transform_4(%arg0: i32, %arg1: i32) -> (i32, i32) {
    %c0_i32 = arith.constant 0 : i32
    return %arg0, %arg1 : i32, i32
  }
}

</mosaic_0001>

<bundles_post_ra>
// kernel: tpu_custom_call.1
= control target key start
LH: loop header
LB: loop body
LE: loop exit
PB: predicated region body
PF: predicated region fallthrough
CT: control target
= control target key end

     0   :  { %10 = vsyncpa [#allocation4], 0  ;;  %s794_s0 = inlined_call_operand.hbm [shape: f32[8,32], index: 0, kind: input, shape index: {}]   ;;  %s795_s1 = inlined_call_operand.vmem [shape: f32[32,128], index: 1, kind: input, shape index: {}]   ;;  %s796_s2 = inlined_call_operand.vmem [shape: f32[32,1], index: 2, kind: input, shape index: {}]   ;;  %s797_s3 = inlined_call_operand.<no memory space> [shape: f32[1], index: 3, kind: input, shape index: {}]   ;;  %s798_s4 = inlined_call_operand.hbm [shape: f32[8,128], index: 4, kind: output, shape index: {}]  }
   0x1   :  { %11 = vsyncpa [#allocation5], 0  ;;  %s17_s17 = sshll.u32 %s794_s0, 4  ;;  %s629_s18 = smov [#allocation3]   ;;  %s18_s17 = int_to_ptr.hbm [resolvable:$true] %s17_s17 }
   0x2   :  { %s19_s19 = sshll.u32 %s629_s18, 4  ;;  %s20_s19 = int_to_ptr.vmem [resolvable:$true] %s19_s19 }
   0x3   :  { %22 = dma.hbm_to_vmem [thread:$0]  %s18_s17, 128, %s20_s19, [#allocation4]  }
   0x4   :  { %625 = dma.done.wait [#allocation4], 128  }
   0x5   :  { %626 = vsyncadd [#allocation4], 4294967168  ;;  %v43_v0 = vlaneseq  ;;  %v33_v3 = vld [vmem:[#allocation3] sm:$0xff]  ;;  %v630_v14 = vmov 0   ;;  %v39_v15 = vld [vmem:[%s796_s2 + $0x8] sm:$0xff]  ;;  %vm448_vm0 = vcmask 1041409  }
   0x6   :  { %v67_v4 = vperm.slane %v33_v3, 1  ;;  %v42_v5 = vperm.slane %v33_v3, 0  ;;  %v92_v8 = vperm.slane %v33_v3, 2  ;;  %v117_v9 = vperm.slane %v33_v3, 3  ;;  %v38_v16 = vld [vmem:[%s796_s2] sm:$0xff]  ;;  %v41_v18 = vld [vmem:[%s796_s2 + $0x18] sm:$0xff] }
   0x7   :  { %v44_v1 = vshrl.u32 %v43_v0, 7  ;;  %v142_v10 = vperm.slane %v33_v3, 4  ;;  %v192_v11 = vperm.slane %v33_v3, 6  ;;  %v167_v12 = vperm.slane %v33_v3, 5  ;;  %v40_v19 = vld [vmem:[%s796_s2 + $0x10] sm:$0xff]  ;;  %v688_v42 = vld [vmem:[%s795_s1] sm:$0xff] }
   0x8   :  { %v217_v13 = vperm.slane %v33_v3, 7  ;;  %v693_v43 = vld [vmem:[%s795_s1 + $0x8] sm:$0xff]  ;;  %v698_v44 = vld [vmem:[%s795_s1 + $0x10] sm:$0xff]  ;;  %v704_v47 = vld [vmem:[%s795_s1 + $0x18] sm:$0xff]  ;;  %vm450_vm1 = vcmask 1042434   ;;  %vm452_vm2 = vcmask 1043459  }
   0x9   :  { %485 = vset.pattern.permute.xlu2 %v44_v1  ;;  %v660_v2 = vadd.s32 16, %v44_v1  ;;  %484 = vset.pattern.permute.xlu0 %v44_v1  ;;  %v51_v6 = vadd.s32 8, %v44_v1  ;;  %v63_v7 = vadd.s32 24, %v44_v1  ;;  %vm454_vm3 = vcmask 1044484   ;;  %s471_s12 = sshll.u32 %s798_s4, 4  ;;  %s472_s12 = int_to_ptr.hbm [resolvable:$true] %s471_s12 }
   0xa   :  { %vm456_vm4 = vcmask 1045509   ;;  %vm458_vm5 = vcmask 1046534   ;;  %vm460_vm6 = vcmask 1047559  }
   0xb   :  { %486 = vset.pattern.permute.xlu1 %v660_v2 }
  0x11   :  { %72 = vperm.xlu2 %485, %v67_v4   ;;  %47 = vperm.xlu0 %484, %v42_v5  }
  0x13   :  { %59 = vperm.xlu1 %486, %v42_v5  }
  0x19   :  { %488 = vset.pattern.permute.xlu2 %v51_v6  ;;  %97 = vperm.xlu0 %484, %v92_v8  }
  0x1b   :  { %487 = vset.pattern.permute.xlu1 %v63_v7 }
  0x21   :  { %78 = vperm.xlu2 %488, %v67_v4   ;;  %491 = vset.pattern.permute.xlu0 %v51_v6 }
  0x23   :  { %65 = vperm.xlu1 %487, %v42_v5  }
  0x29   :  { %490 = vset.pattern.permute.xlu2 %v63_v7  ;;  %53 = vperm.xlu0 %491, %v42_v5  }
  0x2b   :  { %489 = vset.pattern.permute.xlu1 %v660_v2 }
  0x31   :  { %90 = vperm.xlu2 %490, %v67_v4   ;;  %128 = vperm.xlu0 %491, %v117_v9  }
  0x33   :  { %84 = vperm.xlu1 %489, %v67_v4  }
  0x39   :  { %493 = vset.pattern.permute.xlu2 %v660_v2  ;;  %500 = vset.pattern.permute.xlu0 %v660_v2 }
  0x3b   :  { %492 = vset.pattern.permute.xlu1 %v51_v6 }
  0x41   :  { %109 = vperm.xlu2 %493, %v92_v8   ;;  %159 = vperm.xlu0 %500, %v142_v10  }
  0x43   :  { %103 = vperm.xlu1 %492, %v92_v8  }
  0x49   :  { %495 = vset.pattern.permute.xlu2 %v44_v1  ;;  %209 = vperm.xlu0 %500, %v192_v11  }
  0x4b   :  { %494 = vset.pattern.permute.xlu1 %v63_v7 }
  0x51   :  { %122 = vperm.xlu2 %495, %v117_v9   ;;  %507 = vset.pattern.permute.xlu0 %v63_v7 }
  0x53   :  { %115 = vperm.xlu1 %494, %v92_v8  }
  0x59   :  { %497 = vset.pattern.permute.xlu2 %v63_v7  ;;  %190 = vperm.xlu0 %507, %v167_v12  }
  0x5b   :  { %496 = vset.pattern.permute.xlu1 %v660_v2 }
  0x61   :  { %140 = vperm.xlu2 %497, %v117_v9   ;;  %240 = vperm.xlu0 %507, %v217_v13  }
  0x63   :  { %134 = vperm.xlu1 %496, %v117_v9  }
  0x69   :  { %499 = vset.pattern.permute.xlu2 %v51_v6  ;;  %512 = vset.pattern.permute.xlu0 %v630_v14 }
  0x6b   :  { %498 = vset.pattern.permute.xlu1 %v44_v1  ;;  %v73_v17 = vpop.permute.xlu2 %72 }
  0x6c   :  { %v246_v46 = vadd.f32 %v73_v17, %v688_v42 }
  0x6e   :  { %513 = vtanh.f32 %v246_v46 }
  0x71   :  { %153 = vperm.xlu2 %499, %v142_v10  }
  0x73   :  { %147 = vperm.xlu1 %498, %v142_v10  }
  0x74   :  { %v717_v60 = vpop.eup %513 }
  0x79   :  { %502 = vset.pattern.permute.xlu2 %v44_v1 }
  0x7b   :  { %501 = vset.pattern.permute.xlu1 %v63_v7  ;;  %v79_v20 = vpop.permute.xlu2 %78 }
  0x7c   :  { %v247_v48 = vadd.f32 %v79_v20, %v693_v43 }
  0x7e   :  { %515 = vtanh.f32 %v247_v48 }
  0x81   :  { %172 = vperm.xlu2 %502, %v167_v12  }
  0x83   :  { %165 = vperm.xlu1 %501, %v142_v10   ;;  %v48_v27 = vpop.permute.xlu0 %47 }
  0x84   :  { %v720_v62 = vpop.eup %515  ;;  %v242_v63 = vadd.f32 %v48_v27, %v688_v42 }
  0x85   :  { %v60_v21 = vpop.permute.xlu1 %59 }
  0x86   :  { %v244_v49 = vadd.f32 %v60_v21, %v698_v44 }
  0x88   :  { %517 = vtanh.f32 %v244_v49 }
  0x89   :  { %504 = vset.pattern.permute.xlu2 %v660_v2 }
  0x8b   :  { %503 = vset.pattern.permute.xlu1 %v51_v6  ;;  %v91_v22 = vpop.permute.xlu2 %90  ;;  %v98_v31 = vpop.permute.xlu0 %97 }
  0x8c   :  { %v249_v50 = vadd.f32 %v91_v22, %v704_v47  ;;  %v250_v4 = vadd.f32 %v98_v31, %v688_v42 }
  0x8e   :  { %519 = vtanh.f32 %v249_v50 }
  0x91   :  { %184 = vperm.xlu2 %504, %v167_v12  }
  0x93   :  { %178 = vperm.xlu1 %503, %v167_v12  }
  0x95   :  { %v66_v23 = vpop.permute.xlu1 %65 }
  0x96   :  { %v245_v52 = vadd.f32 %v66_v23, %v704_v47 }
  0x98   :  { %521 = vtanh.f32 %v245_v52 }
  0x99   :  { %506 = vset.pattern.permute.xlu2 %v51_v6 }
  0x9b   :  { %505 = vset.pattern.permute.xlu1 %v44_v1  ;;  %v110_v24 = vpop.permute.xlu2 %109  ;;  %v54_v34 = vpop.permute.xlu0 %53 }
  0x9c   :  { %v252_v53 = vadd.f32 %v110_v24, %v698_v44  ;;  %v723_v1 = vpop.eup %517  ;;  %v243_v8 = vadd.f32 %v54_v34, %v693_v43 }
  0x9d   :  { %v726_v3 = vpop.eup %519 }
  0x9e   :  { %523 = vtanh.f32 %v252_v53  ;;  %v729_v5 = vpop.eup %521 }
  0xa1   :  { %203 = vperm.xlu2 %506, %v192_v11  }
  0xa3   :  { %197 = vperm.xlu1 %505, %v192_v11   ;;  %v129_v37 = vpop.permute.xlu0 %128 }
  0xa5   :  { %v85_v25 = vpop.permute.xlu1 %84 }
  0xa6   :  { %v248_v54 = vadd.f32 %v85_v25, %v698_v44 }
  0xa8   :  { %525 = vtanh.f32 %v248_v54 }
  0xa9   :  { %228 = vperm.xlu2 %506, %v217_v13  }
  0xab   :  { %222 = vperm.xlu1 %505, %v217_v13   ;;  %v123_v26 = vpop.permute.xlu2 %122 }
  0xac   :  { %v254_v56 = vadd.f32 %v123_v26, %v688_v42 }
  0xae   :  { %527 = vtanh.f32 %v254_v56 }
  0xb1   :  { %509 = vset.pattern.permute.xlu2 %v63_v7  ;;  %v732_v7 = vpop.eup %523 }
  0xb2   :  { %v735_v9 = vpop.eup %525 }
  0xb3   :  { %508 = vset.pattern.permute.xlu1 %v660_v2  ;;  %v683_v40 = vpop.permute.xlu0 %159 }
  0xb4   :  { %v738_v12 = vpop.eup %527 }
  0xb5   :  { %v104_v28 = vpop.permute.xlu1 %103 }
  0xb6   :  { %v251_v58 = vadd.f32 %v104_v28, %v693_v43 }
  0xb8   :  { %529 = vtanh.f32 %v251_v58 }
  0xb9   :  { %215 = vperm.xlu2 %509, %v192_v11  }
  0xbb   :  { %234 = vperm.xlu1 %508, %v217_v13   ;;  %v141_v29 = vpop.permute.xlu2 %140  ;;  %v709_v51 = vpop.permute.xlu0 %209 }
  0xbc   :  { %v257_v59 = vadd.f32 %v141_v29, %v704_v47  ;;  %v268_v48 = vadd.f32 %v709_v51, %v698_v44 }
  0xbe   :  { %531 = vtanh.f32 %v257_v59 }
  0xc1   :  { %511 = vset.pattern.permute.xlu2 %v630_v14 }
  0xc2   :  { %313 = vperm.xlu2 %511, %v39_v15   ;;  %v530_v15 = vpop.eup %529 }
  0xc3   :  { %510 = vset.pattern.permute.xlu1 %v630_v14 }
  0xc4   :  { %308 = vperm.xlu1 %510, %v38_v16   ;;  %v255_v16 = vadd.f32 %v129_v37, %v693_v43  ;;  %v742_v17 = vpop.eup %531 }
  0xc5   :  { %v116_v30 = vpop.permute.xlu1 %115 }
  0xc6   :  { %v253_v61 = vadd.f32 %v116_v30, %v704_v47 }
  0xc8   :  { %533 = vtanh.f32 %v253_v61 }
  0xc9   :  { %535 = vtanh.f32 %v242_v63 }
  0xca   :  { %323 = vperm.xlu2 %511, %v41_v18  }
  0xcb   :  { %v154_v32 = vpop.permute.xlu2 %153  ;;  %v191_v0 = vpop.permute.xlu0 %190 }
  0xcc   :  { %318 = vperm.xlu1 %510, %v40_v19   ;;  %v259_v2 = vadd.f32 %v154_v32, %v693_v43  ;;  %v265_v27 = vadd.f32 %v191_v0, %v704_v47 }
  0xce   :  { %537 = vtanh.f32 %v259_v2  ;;  %v745_v19 = vpop.eup %533 }
  0xcf   :  { %539 = vtanh.f32 %v250_v4  ;;  %v536_v21 = vpop.eup %535 }
  0xd3   :  { %v241_v23 = vpop.permute.xlu0 %240 }
  0xd4   :  { %v538_v24 = vpop.eup %537  ;;  %v273_v29 = vadd.f32 %v241_v23, %v704_v47 }
  0xd5   :  { %v135_v33 = vpop.permute.xlu1 %134  ;;  %v540_v26 = vpop.eup %539 }
  0xd6   :  { %v256_v6 = vadd.f32 %v135_v33, %v698_v44 }
  0xd8   :  { %541 = vtanh.f32 %v256_v6 }
  0xd9   :  { %543 = vtanh.f32 %v243_v8 }
  0xdb   :  { %v173_v35 = vpop.permute.xlu2 %172 }
  0xdc   :  { %v262_v10 = vadd.f32 %v173_v35, %v688_v42 }
  0xde   :  { %545 = vtanh.f32 %v262_v10  ;;  %v751_v28 = vpop.eup %541 }
  0xdf   :  { %v544_v30 = vpop.eup %543 }
  0xe4   :  { %v546_v33 = vpop.eup %545 }
  0xe5   :  { %v148_v36 = vpop.permute.xlu1 %147 }
  0xe6   :  { %v258_v13 = vadd.f32 %v148_v36, %v688_v42 }
  0xe8   :  { %547 = vtanh.f32 %v258_v13 }
  0xe9   :  { %549 = vtanh.f32 %v255_v16 }
  0xeb   :  { %v185_v38 = vpop.permute.xlu2 %184 }
  0xec   :  { %v264_v18 = vadd.f32 %v185_v38, %v698_v44 }
  0xee   :  { %551 = vtanh.f32 %v264_v18  ;;  %v548_v36 = vpop.eup %547 }
  0xef   :  { %v550_v38 = vpop.eup %549 }
  0xf5   :  { %v681_v39 = vpop.permute.xlu1 %165 }
  0xfb   :  { %v204_v41 = vpop.permute.xlu2 %203 }
  0xfc   :  { %v267_v20 = vadd.f32 %v204_v41, %v693_v43  ;;  %v261_v41 = vadd.f32 %v681_v39, %v704_v47 }
  0xfe   :  { %553 = vtanh.f32 %v267_v20 }
 0x103   :  { %v229_v55 = vpop.permute.xlu2 %228 }
 0x104   :  { %v271_v22 = vadd.f32 %v229_v55, %v693_v43 }
 0x105   :  { %v179_v45 = vpop.permute.xlu1 %178 }
 0x106   :  { %v263_v25 = vadd.f32 %v179_v45, %v693_v43  ;;  %555 = vtanh.f32 %v271_v22  ;;  %v759_v43 = vpop.eup %551  ;;  %v260_v45 = vadd.f32 %v683_v40, %v698_v44 }
 0x107   :  { %v554_v46 = vpop.eup %553 }
 0x108   :  { %557 = vtanh.f32 %v263_v25 }
 0x109   :  { %559 = vtanh.f32 %v265_v27 }
 0x10a   :  { %561 = vtanh.f32 %v273_v29  ;;  %v776_v29 = vstv %s797_s3  ;;  %s631_s3 = smov [#allocation6]  }
 0x10b   :  { %s469_s9 = sshll.u32 %s631_s3, 4  ;;  %s470_s9 = int_to_ptr.vmem [resolvable:$true] %s469_s9 }
 0x10c   :  { %v556_v49 = vpop.eup %555 }
 0x113   :  { %v216_v11 = vpop.permute.xlu2 %215 }
 0x114   :  { %v269_v31 = vadd.f32 %v216_v11, %v704_v47 }
 0x115   :  { %v198_v57 = vpop.permute.xlu1 %197 }
 0x116   :  { %v266_v34 = vadd.f32 %v198_v57, %v688_v42  ;;  %563 = vtanh.f32 %v269_v31 }
 0x118   :  { %565 = vtanh.f32 %v266_v34 }
 0x11c   :  { %v314_v35 = vpop.permute.xlu2 %313 }
 0x11d   :  { %v223_v14 = vpop.permute.xlu1 %222  ;;  %v327_v47 = vmul.f32 %v544_v30, %v314_v35  ;;  %v331_v53 = vmul.f32 %v720_v62, %v314_v35  ;;  %v335_v55 = vmul.f32 %v530_v15, %v314_v35  ;;  %v339_v56 = vmul.f32 %v550_v38, %v314_v35 }
 0x11e   :  { %v270_v37 = vadd.f32 %v223_v14, %v688_v42  ;;  %v558_v42 = vpop.eup %557  ;;  %v343_v57 = vmul.f32 %v538_v24, %v314_v35  ;;  %v351_v61 = vmul.f32 %v554_v46, %v314_v35  ;;  %v355_v63 = vmul.f32 %v556_v49, %v314_v35 }
 0x11f   :  { %v560_v52 = vpop.eup %559  ;;  %v347_v59 = vmul.f32 %v558_v42, %v314_v35 }
 0x120   :  { %567 = vtanh.f32 %v270_v37  ;;  %v562_v39 = vpop.eup %561 }
 0x121   :  { %569 = vtanh.f32 %v261_v41  ;;  %v564_v40 = vpop.eup %563 }
 0x122   :  { %571 = vtanh.f32 %v260_v45  ;;  %v566_v58 = vpop.eup %565 }
 0x123   :  { %573 = vtanh.f32 %v268_v48 }
 0x124   :  { %v324_v0 = vpop.permute.xlu2 %323 }
 0x125   :  { %v333_v16 = vmul.f32 %v726_v3, %v324_v0  ;;  %v337_v18 = vmul.f32 %v745_v19, %v324_v0  ;;  %v341_v20 = vmul.f32 %v742_v17, %v324_v0  ;;  %v353_v23 = vmul.f32 %v564_v40, %v324_v0 }
 0x126   :  { %v349_v24 = vmul.f32 %v560_v52, %v324_v0 }
 0x12d   :  { %v235_v32 = vpop.permute.xlu1 %234 }
 0x12e   :  { %v272_v50 = vadd.f32 %v235_v32, %v698_v44  ;;  %v568_v44 = vpop.eup %567 }
 0x12f   :  { %v570_v8 = vpop.eup %569 }
 0x130   :  { %575 = vtanh.f32 %v272_v50  ;;  %v572_v15 = vpop.eup %571 }
 0x131   :  { %v574_v22 = vpop.eup %573 }
 0x136   :  { %v309_v54 = vpop.permute.xlu1 %308 }
 0x137   :  { %v330_v51 = vmul.f32 %v717_v60, %v309_v54  ;;  %v326_v2 = vmul.f32 %v536_v21, %v309_v54  ;;  %v334_v4 = vmul.f32 %v540_v26, %v309_v54  ;;  %v338_v6 = vmul.f32 %v738_v12, %v309_v54 }
 0x138   :  { %v342_v10 = vmul.f32 %v548_v36, %v309_v54  ;;  %v346_v11 = vmul.f32 %v546_v33, %v309_v54  ;;  %v350_v13 = vmul.f32 %v566_v58, %v309_v54  ;;  %v354_v14 = vmul.f32 %v568_v44, %v309_v54 }
 0x139   :  { %v367_v62 = vadd.f32 %v331_v53, %v330_v51  ;;  %v329_v60 = vmul.f32 %v729_v5, %v324_v0  ;;  %v345_v21 = vmul.f32 %v570_v8, %v324_v0  ;;  %v357_v12 = vmul.f32 %v562_v39, %v324_v0  ;;  %v576_v5 = vpop.eup %575 }
 0x13a   :  { %v358_v25 = vadd.f32 %v327_v47, %v326_v2  ;;  %v376_v26 = vadd.f32 %v335_v55, %v334_v4  ;;  %v385_v27 = vadd.f32 %v339_v56, %v338_v6  ;;  %v394_v30 = vadd.f32 %v343_v57, %v342_v10 }
 0x13b   :  { %v403_v3 = vadd.f32 %v347_v59, %v346_v11  ;;  %v412_v31 = vadd.f32 %v351_v61, %v350_v13  ;;  %v421_v19 = vadd.f32 %v355_v63, %v354_v14 }
 0x13e   :  { %v319_v32 = vpop.permute.xlu1 %318 }
 0x13f   :  { %v328_v17 = vmul.f32 %v723_v1, %v319_v32  ;;  %v332_v33 = vmul.f32 %v735_v9, %v319_v32  ;;  %v336_v34 = vmul.f32 %v732_v7, %v319_v32  ;;  %v340_v35 = vmul.f32 %v751_v28, %v319_v32 }
 0x140   :  { %v344_v36 = vmul.f32 %v572_v15, %v319_v32  ;;  %v348_v37 = vmul.f32 %v759_v43, %v319_v32  ;;  %v352_v38 = vmul.f32 %v574_v22, %v319_v32  ;;  %v356_v41 = vmul.f32 %v576_v5, %v319_v32 }
 0x141   :  { %v359_v45 = vadd.f32 %v358_v25, %v328_v17  ;;  %v368_v46 = vadd.f32 %v367_v62, %v332_v33  ;;  %v377_v48 = vadd.f32 %v376_v26, %v336_v34  ;;  %v386_v49 = vadd.f32 %v385_v27, %v340_v35 }
 0x142   :  { %v395_v42 = vadd.f32 %v394_v30, %v344_v36  ;;  %v404_v50 = vadd.f32 %v403_v3, %v348_v37  ;;  %v413_v52 = vadd.f32 %v412_v31, %v352_v38  ;;  %v422_v39 = vadd.f32 %v421_v19, %v356_v41 }
 0x143   :  { %v360_v1 = vadd.f32 %v359_v45, %v329_v60  ;;  %v369_v47 = vadd.f32 %v368_v46, %v333_v16  ;;  %v378_v9 = vadd.f32 %v377_v48, %v337_v18  ;;  %v387_v53 = vadd.f32 %v386_v49, %v341_v20 }
 0x144   :  { %v396_v7 = vadd.f32 %v395_v42, %v345_v21  ;;  %v405_v54 = vadd.f32 %v404_v50, %v349_v24  ;;  %v414_v28 = vadd.f32 %v413_v52, %v353_v23  ;;  %v423_v40 = vadd.f32 %v422_v39, %v357_v12 }
 0x145   :  { %v361_v55 = vrot.slane %v360_v1, 4  ;;  %v370_v43 = vrot.slane %v369_v47, 4  ;;  %v379_v56 = vrot.slane %v378_v9, 4  ;;  %v388_v57 = vrot.slane %v387_v53, 4 }
 0x146   :  { %v397_v51 = vrot.slane %v396_v7, 4  ;;  %v406_v58 = vrot.slane %v405_v54, 4  ;;  %v415_v59 = vrot.slane %v414_v28, 4  ;;  %v424_v61 = vrot.slane %v423_v40, 4 }
 0x147   :  { %v362_v63 = vadd.f32 %v361_v55, %v360_v1  ;;  %v371_v0 = vadd.f32 %v370_v43, %v369_v47  ;;  %v380_v44 = vadd.f32 %v379_v56, %v378_v9  ;;  %v389_v2 = vadd.f32 %v388_v57, %v387_v53 }
 0x148   :  { %v398_v4 = vadd.f32 %v397_v51, %v396_v7  ;;  %v407_v6 = vadd.f32 %v406_v58, %v405_v54  ;;  %v416_v62 = vadd.f32 %v415_v59, %v414_v28  ;;  %v425_v8 = vadd.f32 %v424_v61, %v423_v40 }
 0x149   :  { %v363_v10 = vrot.slane %v362_v63, 2  ;;  %v372_v11 = vrot.slane %v371_v0, 2  ;;  %v381_v13 = vrot.slane %v380_v44, 2  ;;  %v390_v14 = vrot.slane %v389_v2, 2 }
 0x14a   :  { %v399_v15 = vrot.slane %v398_v4, 2  ;;  %v408_v60 = vrot.slane %v407_v6, 2  ;;  %v417_v16 = vrot.slane %v416_v62, 2  ;;  %v426_v18 = vrot.slane %v425_v8, 2 }
 0x14b   :  { %v364_v20 = vadd.f32 %v363_v10, %v362_v63  ;;  %v373_v22 = vadd.f32 %v372_v11, %v371_v0  ;;  %v382_v21 = vadd.f32 %v381_v13, %v380_v44  ;;  %v391_v23 = vadd.f32 %v390_v14, %v389_v2 }
 0x14c   :  { %v400_v24 = vadd.f32 %v399_v15, %v398_v4  ;;  %v409_v12 = vadd.f32 %v408_v60, %v407_v6  ;;  %v418_v25 = vadd.f32 %v417_v16, %v416_v62  ;;  %v427_v26 = vadd.f32 %v426_v18, %v425_v8 }
 0x14d   :  { %v365_v27 = vrot.slane %v364_v20, 1  ;;  %v374_v5 = vrot.slane %v373_v22, 1  ;;  %v383_v30 = vrot.slane %v382_v21, 1  ;;  %v392_v3 = vrot.slane %v391_v23, 1 }
 0x14e   :  { %v401_v31 = vrot.slane %v400_v24, 1  ;;  %v410_v19 = vrot.slane %v409_v12, 1  ;;  %v419_v32 = vrot.slane %v418_v25, 1  ;;  %v428_v17 = vrot.slane %v427_v26, 1 }
 0x14f   :  { %v366_v33 = vadd.f32 %v365_v27, %v364_v20  ;;  %v375_v34 = vadd.f32 %v374_v5, %v373_v22  ;;  %v384_v35 = vadd.f32 %v383_v30, %v382_v21  ;;  %v393_v36 = vadd.f32 %v392_v3, %v391_v23 }
 0x150   :  { %v402_v37 = vadd.f32 %v401_v31, %v400_v24  ;;  %v411_v38 = vadd.f32 %v410_v19, %v409_v12  ;;  %v420_v48 = vadd.f32 %v419_v32, %v418_v25  ;;  %v429_v49 = vadd.f32 %v428_v17, %v427_v26 }
 0x151   :  { %v432_v41 = vadd.f32 %v776_v29, %v366_v33  ;;  %v433_v45 = vadd.f32 %v776_v29, %v375_v34  ;;  %v434_v46 = vadd.f32 %v776_v29, %v384_v35  ;;  %v435_v42 = vadd.f32 %v776_v29, %v393_v36 }
 0x152   :  { %v436_v52 = vadd.f32 %v776_v29, %v402_v37  ;;  %v437_v1 = vadd.f32 %v776_v29, %v411_v38  ;;  %v438_v9 = vadd.f32 %v776_v29, %v420_v48  ;;  %v439_v7 = vadd.f32 %v776_v29, %v429_v49 }
 0x153   :  { %v449_v50 = vsel %vm448_vm0, %v433_v45, %v432_v41 }
 0x154   :  { %v451_v39 = vsel %vm450_vm1, %v434_v46, %v449_v50 }
 0x155   :  { %v453_v47 = vsel %vm452_vm2, %v435_v42, %v451_v39 }
 0x156   :  { %v455_v53 = vsel %vm454_vm3, %v436_v52, %v453_v47 }
 0x157   :  { %v457_v54 = vsel %vm456_vm4, %v437_v1, %v455_v53 }
 0x158   :  { %v459_v28 = vsel %vm458_vm5, %v438_v9, %v457_v54 }
 0x159   :  { %v461_v40 = vsel %vm460_vm6, %v439_v7, %v459_v28 }
 0x15a   :  { %463 = vst [vmem:[#allocation6] sm:$0xff] %v461_v40 }
 0x15b   :  { %474 = dma.vmem_to_hbm [thread:$0]  %s470_s9, 128, %s472_s12, [#allocation5]  }
 0x15c   :  { %627 = dma.done.wait [#allocation5], 128  }
 0x15d   :  { %628 = vsyncadd [#allocation5], 4294967168 }
 0x15e   :  { %479 = vsyncpa [#allocation4], 1 }
 0x15f   :  { %480 = vsyncpa [#allocation5], 1 }

</bundles_post_ra>
